<compile_context>
chip_gen: v5e
topology: v5e:2x2
jax: 0.10.0
libtpu: 0.0.40
codegen_flags: <defaults>
</compile_context>

<pallas_src>
import math

import jax
import jax.numpy as jnp
from jax.experimental import pallas as pl
from jax.experimental.pallas import tpu as pltpu


def _translator_kernel(z1_ref, fz2_ref, w1a_ref, w1b_ref, b1_ref,
                       w2_ref, b2_ref, out_ref):
    # z1_ref:  (S*B, H)  -- sequence flattened into the row (M) dimension
    # fz2_ref: (S*B, H)  -- fz2 broadcast along S (same row ordering)
    # w1a_ref: (H, H)    -- W1^T rows [0:H)   (acts on z1)
    # w1b_ref: (H, H)    -- W1^T rows [H:2H)  (acts on fz2)
    # b1_ref:  (1, H)
    # w2_ref:  (H, H)    -- W2^T
    # b2_ref:  (1, H)
    # out_ref: (S*B, H)
    #
    # cat([z1, fz2], dim=1) @ W1^T == z1 @ W1a + fz2 @ W1b  (split-matmul fusion)
    h = (jnp.dot(z1_ref[...], w1a_ref[...], preferred_element_type=jnp.float32)
         + jnp.dot(fz2_ref[...], w1b_ref[...], preferred_element_type=jnp.float32)
         + b1_ref[...])
    # LeakyReLU(0.2)
    h = jnp.where(h > 0, h, 0.2 * h)
    y = jnp.dot(h, w2_ref[...], preferred_element_type=jnp.float32) + b2_ref[...]
    out_ref[...] = y.astype(out_ref.dtype)


def translator_net(z1_seq, fz2, w1, b1, w2, b2):
    """z1_seq: [S, B, H], fz2: [B, H].
    w1: [H, 2H], b1: [H], w2: [H, H], b2: [H]  (PyTorch Linear layout).
    Returns [S, B, H]."""
    S, B, H = z1_seq.shape
    assert fz2.shape == (B, H)
    assert w1.shape == (H, 2 * H) and w2.shape == (H, H)

    SB = S * B
    itemsize = jnp.dtype(jnp.float32).itemsize

    # Wrapper-side (cheap, one-time) layout prep:
    w1_t = jnp.transpose(w1)            # (2H, H)
    w1a = w1_t[:H, :]                   # (H, H) -- multiplies z1
    w1b = w1_t[H:, :]                   # (H, H) -- multiplies fz2
    w2_t = jnp.transpose(w2)            # (H, H)
    b1_2d = b1.reshape(1, H)
    b2_2d = b2.reshape(1, H)

    z1_flat = z1_seq.reshape(SB, H)                 # row r = s*B + b
    fz2_rep = jnp.tile(fz2, (S, 1))                 # (S*B, H), same row ordering

    cost = pl.CostEstimate(
        flops=2 * SB * H * (2 * H) + 2 * SB * H * H,          # layer1 + layer2
        transcendentals=0,
        bytes_accessed=(z1_flat.size + fz2_rep.size + w1a.size + w1b.size
                        + b1_2d.size + w2_t.size + b2_2d.size + SB * H) * itemsize,
    )

    out_flat = pl.pallas_call(
        _translator_kernel,
        out_shape=jax.ShapeDtypeStruct((SB, H), z1_seq.dtype),
        grid_spec=pltpu.PrefetchScalarGridSpec(
            num_scalar_prefetch=0,
            grid=(1,),  # collapsed: whole problem in one invocation
            in_specs=[
                pl.BlockSpec((SB, H), lambda i: (0, 0)),   # z1 flattened
                pl.BlockSpec((SB, H), lambda i: (0, 0)),   # fz2 broadcast over S
                pl.BlockSpec((H, H), lambda i: (0, 0)),    # W1a
                pl.BlockSpec((H, H), lambda i: (0, 0)),    # W1b
                pl.BlockSpec((1, H), lambda i: (0, 0)),    # b1
                pl.BlockSpec((H, H), lambda i: (0, 0)),    # W2^T
                pl.BlockSpec((1, H), lambda i: (0, 0)),    # b2
            ],
            out_specs=pl.BlockSpec((SB, H), lambda i: (0, 0)),
        ),
        compiler_params=pltpu.CompilerParams(
            dimension_semantics=("arbitrary",)),
        cost_estimate=cost,
    )(z1_flat, fz2_rep, w1a, w1b, b1_2d, w2_t, b2_2d)

    return out_flat.reshape(S, B, H)


def _init_linear(key, out_features, in_features, dtype=jnp.float32):
    # Deterministic init mimicking PyTorch nn.Linear default:
    # U(-1/sqrt(fan_in), 1/sqrt(fan_in))
    kw, kb = jax.random.split(key)
    bound = 1.0 / math.sqrt(in_features)
    w = jax.random.uniform(kw, (out_features, in_features), dtype, -bound, bound)
    b = jax.random.uniform(kb, (out_features,), dtype, -bound, bound)
    return w, b


def _reference(z1_seq, fz2, w1, b1, w2, b2):
    # pure-JAX reference of the PyTorch forward
    def step(z1):
        x = jnp.concatenate([z1, fz2], axis=1)
        h = x @ w1.T + b1
        h = jnp.where(h > 0, h, 0.2 * h)
        return h @ w2.T + b2
    return jax.vmap(step)(z1_seq)


if __name__ == "__main__":
    S, B, H = 8, 4, 32   # seq len, batch, hidden_dim

    key = jax.random.PRNGKey(0)
    k_z1, k_fz2, k_l1, k_l2 = jax.random.split(key, 4)

    z1_seq = jax.random.normal(k_z1, (S, B, H), jnp.float32)
    fz2 = jax.random.normal(k_fz2, (B, H), jnp.float32)

    w1, b1 = _init_linear(k_l1, H, 2 * H)   # Linear(2H -> H)
    w2, b2 = _init_linear(k_l2, H, H)       # Linear(H -> H)

    out = translator_net(z1_seq, fz2, w1, b1, w2, b2)
    out = jax.block_until_ready(out)

    ref = _reference(z1_seq, fz2, w1, b1, w2, b2)
    assert out.shape == (S, B, H)
    assert jnp.allclose(out, ref, atol=1e-5, rtol=1e-5), "mismatch vs reference"

    print("KERNEL_OK")
</pallas_src>

<mosaic_0001>
module attributes {stable_mosaic.version = 11 : i64} {
  func.func @_translator_kernel(%arg0: i32, %arg1: memref<32x32xf32, #tpu.memory_space<vmem>>, %arg2: memref<32x32xf32, #tpu.memory_space<vmem>>, %arg3: memref<32x32xf32, #tpu.memory_space<vmem>>, %arg4: memref<32x32xf32, #tpu.memory_space<vmem>>, %arg5: memref<1x32xf32, #tpu.memory_space<vmem>>, %arg6: memref<32x32xf32, #tpu.memory_space<vmem>>, %arg7: memref<1x32xf32, #tpu.memory_space<vmem>>, %arg8: memref<32x32xf32, #tpu.memory_space<vmem>>) attributes {dimension_semantics = [#tpu.dimension_semantics<arbitrary>], iteration_bounds = array<i64: 1>, scalar_prefetch = 0 : i64, scratch_operands = 0 : i64, tpu.core_type = #tpu.core_type<tc>, window_params = [{pipeline_mode = #tpu.pipeline_mode<synchronous>, transform_indices = @transform_0, window_bounds = array<i64: 32, 32>}, {pipeline_mode = #tpu.pipeline_mode<synchronous>, transform_indices = @transform_1, window_bounds = array<i64: 32, 32>}, {pipeline_mode = #tpu.pipeline_mode<synchronous>, transform_indices = @transform_2, window_bounds = array<i64: 32, 32>}, {pipeline_mode = #tpu.pipeline_mode<synchronous>, transform_indices = @transform_3, window_bounds = array<i64: 32, 32>}, {pipeline_mode = #tpu.pipeline_mode<synchronous>, transform_indices = @transform_4, window_bounds = array<i64: 1, 32>}, {pipeline_mode = #tpu.pipeline_mode<synchronous>, transform_indices = @transform_5, window_bounds = array<i64: 32, 32>}, {pipeline_mode = #tpu.pipeline_mode<synchronous>, transform_indices = @transform_6, window_bounds = array<i64: 1, 32>}, {pipeline_mode = #tpu.pipeline_mode<synchronous>, transform_indices = @transform_7, window_bounds = array<i64: 32, 32>}]} {
    %c0 = arith.constant 0 : index
    %c0_0 = arith.constant 0 : index
    %0 = vector.load %arg1[%c0, %c0_0] : memref<32x32xf32, #tpu.memory_space<vmem>>, vector<32x32xf32>
    %c0_1 = arith.constant 0 : index
    %c0_2 = arith.constant 0 : index
    %1 = vector.load %arg3[%c0_1, %c0_2] : memref<32x32xf32, #tpu.memory_space<vmem>>, vector<32x32xf32>
    %cst = arith.constant dense<0.000000e+00> : vector<32x32xf32>
    %2 = tpu.matmul %0, %1, %cst {dimension_numbers = #tpu.dot_dimension_numbers<[1], [0], [0], [1], [0, 0, 1, 1], [], []>} : vector<32x32xf32>, vector<32x32xf32>, vector<32x32xf32> -> vector<32x32xf32>
    %c0_3 = arith.constant 0 : index
    %c0_4 = arith.constant 0 : index
    %3 = vector.load %arg2[%c0_3, %c0_4] : memref<32x32xf32, #tpu.memory_space<vmem>>, vector<32x32xf32>
    %c0_5 = arith.constant 0 : index
    %c0_6 = arith.constant 0 : index
    %4 = vector.load %arg4[%c0_5, %c0_6] : memref<32x32xf32, #tpu.memory_space<vmem>>, vector<32x32xf32>
    %cst_7 = arith.constant dense<0.000000e+00> : vector<32x32xf32>
    %5 = tpu.matmul %3, %4, %cst_7 {dimension_numbers = #tpu.dot_dimension_numbers<[1], [0], [0], [1], [0, 0, 1, 1], [], []>} : vector<32x32xf32>, vector<32x32xf32>, vector<32x32xf32> -> vector<32x32xf32>
    %6 = arith.addf %2, %5 : vector<32x32xf32>
    %c0_8 = arith.constant 0 : index
    %c0_9 = arith.constant 0 : index
    %7 = vector.load %arg5[%c0_8, %c0_9] : memref<1x32xf32, #tpu.memory_space<vmem>>, vector<1x32xf32>
    %8 = vector.broadcast %7 : vector<1x32xf32> to vector<32x32xf32>
    %9 = arith.addf %6, %8 : vector<32x32xf32>
    %cst_10 = arith.constant 0.000000e+00 : f32
    %10 = vector.broadcast %cst_10 : f32 to vector<32x32xf32>
    %11 = arith.cmpf ogt, %9, %10 : vector<32x32xf32>
    %cst_11 = arith.constant 2.000000e-01 : f32
    %12 = vector.broadcast %cst_11 : f32 to vector<32x32xf32>
    %13 = arith.mulf %12, %9 : vector<32x32xf32>
    %14 = arith.select %11, %9, %13 : vector<32x32xi1>, vector<32x32xf32>
    %c0_12 = arith.constant 0 : index
    %c0_13 = arith.constant 0 : index
    %15 = vector.load %arg6[%c0_12, %c0_13] : memref<32x32xf32, #tpu.memory_space<vmem>>, vector<32x32xf32>
    %cst_14 = arith.constant dense<0.000000e+00> : vector<32x32xf32>
    %16 = tpu.matmul %14, %15, %cst_14 {dimension_numbers = #tpu.dot_dimension_numbers<[1], [0], [0], [1], [0, 0, 1, 1], [], []>} : vector<32x32xf32>, vector<32x32xf32>, vector<32x32xf32> -> vector<32x32xf32>
    %c0_15 = arith.constant 0 : index
    %c0_16 = arith.constant 0 : index
    %17 = vector.load %arg7[%c0_15, %c0_16] : memref<1x32xf32, #tpu.memory_space<vmem>>, vector<1x32xf32>
    %18 = vector.broadcast %17 : vector<1x32xf32> to vector<32x32xf32>
    %19 = arith.addf %16, %18 : vector<32x32xf32>
    %c0_17 = arith.constant 0 : index
    %c0_18 = arith.constant 0 : index
    %20 = vector.load %arg8[%c0_17, %c0_18] : memref<32x32xf32, #tpu.memory_space<vmem>>, vector<32x32xf32>
    tpu.vector_store %arg8[%c0_17, %c0_18], %19 {strides = array<i32>} : memref<32x32xf32, #tpu.memory_space<vmem>>, vector<32x32xf32>,
    return
  }
  func.func @transform_0(%arg0: i32) -> (i32, i32) {
    %c0_i32 = arith.constant 0 : i32
    %c0_i32_0 = arith.constant 0 : i32
    %c0_i32_1 = arith.constant 0 : i32
    return %c0_i32, %c0_i32_0 : i32, i32
  }
  func.func @transform_1(%arg0: i32) -> (i32, i32) {
    %c0_i32 = arith.constant 0 : i32
    %c0_i32_0 = arith.constant 0 : i32
    %c0_i32_1 = arith.constant 0 : i32
    return %c0_i32, %c0_i32_0 : i32, i32
  }
  func.func @transform_2(%arg0: i32) -> (i32, i32) {
    %c0_i32 = arith.constant 0 : i32
    %c0_i32_0 = arith.constant 0 : i32
    %c0_i32_1 = arith.constant 0 : i32
    return %c0_i32, %c0_i32_0 : i32, i32
  }
  func.func @transform_3(%arg0: i32) -> (i32, i32) {
    %c0_i32 = arith.constant 0 : i32
    %c0_i32_0 = arith.constant 0 : i32
    %c0_i32_1 = arith.constant 0 : i32
    return %c0_i32, %c0_i32_0 : i32, i32
  }
  func.func @transform_4(%arg0: i32) -> (i32, i32) {
    %c0_i32 = arith.constant 0 : i32
    %c0_i32_0 = arith.constant 0 : i32
    %c0_i32_1 = arith.constant 0 : i32
    return %c0_i32, %c0_i32_0 : i32, i32
  }
  func.func @transform_5(%arg0: i32) -> (i32, i32) {
    %c0_i32 = arith.constant 0 : i32
    %c0_i32_0 = arith.constant 0 : i32
    %c0_i32_1 = arith.constant 0 : i32
    return %c0_i32, %c0_i32_0 : i32, i32
  }
  func.func @transform_6(%arg0: i32) -> (i32, i32) {
    %c0_i32 = arith.constant 0 : i32
    %c0_i32_0 = arith.constant 0 : i32
    %c0_i32_1 = arith.constant 0 : i32
    return %c0_i32, %c0_i32_0 : i32, i32
  }
  func.func @transform_7(%arg0: i32) -> (i32, i32) {
    %c0_i32 = arith.constant 0 : i32
    %c0_i32_0 = arith.constant 0 : i32
    %c0_i32_1 = arith.constant 0 : i32
    return %c0_i32, %c0_i32_0 : i32, i32
  }
}

</mosaic_0001>

<bundles_post_ra>
// kernel: tpu_custom_call.1
= control target key start
LH: loop header
LB: loop body
LE: loop exit
PB: predicated region body
PF: predicated region fallthrough
CT: control target
= control target key end

     0   :  { %12 = vsyncpa [#allocation3], 0  ;;  %s590_s0 = inlined_call_operand.hbm [shape: f32[32,32], index: 0, kind: input, shape index: {}]   ;;  %s591_s1 = inlined_call_operand.hbm [shape: f32[32,32], index: 1, kind: input, shape index: {}]   ;;  %s592_s2 = inlined_call_operand.hbm [shape: f32[32,32], index: 2, kind: input, shape index: {}]   ;;  %s593_s3 = inlined_call_operand.hbm [shape: f32[32,32], index: 3, kind: input, shape index: {}]   ;;  %s594_s4 = inlined_call_operand.vmem [shape: f32[1,32], index: 4, kind: input, shape index: {}]   ;;  %s595_s5 = inlined_call_operand.hbm [shape: f32[32,32], index: 5, kind: input, shape index: {}]   ;;  %s596_s6 = inlined_call_operand.vmem [shape: f32[1,32], index: 6, kind: input, shape index: {}]   ;;  %s597_s7 = inlined_call_operand.hbm [shape: f32[32,32], index: 7, kind: output, shape index: {}]  }
   0x1   :  { %13 = vsyncpa [#allocation6], 0 }
   0x2   :  { %14 = vsyncpa [#allocation9], 0 }
   0x3   :  { %15 = vsyncpa [#allocation4], 0  ;;  %s33_s26 = sshll.u32 %s591_s1, 4  ;;  %s484_s27 = smov [#allocation5]   ;;  %s34_s26 = int_to_ptr.hbm [resolvable:$true] %s33_s26 }
   0x4   :  { %s35_s28 = sshll.u32 %s484_s27, 4  ;;  %s59_s8 = sshll.u32 %s593_s3, 4  ;;  %s36_s28 = int_to_ptr.vmem [resolvable:$true] %s35_s28  ;;  %s60_s8 = int_to_ptr.hbm [resolvable:$true] %s59_s8 }
   0x5   :  { %s485_s9 = smov 128   ;;  %s486_s10 = smov 8  }
   0x6   :  { %41 = dma.hbm_to_vmem [thread:$0]  %s34_s26, 512, %s36_s28, [#allocation6], %s485_s9, %s485_s9, %s486_s10  }
   0x7   :  { %s487_s11 = smov [#allocation8]   ;;  %s20_s1 = sshll.u32 %s590_s0, 4  ;;  %s21_s1 = int_to_ptr.hbm [resolvable:$true] %s20_s1 }
   0x8   :  { %s61_s12 = sshll.u32 %s487_s11, 4  ;;  %s46_s16 = sshll.u32 %s592_s2, 4  ;;  %s62_s12 = int_to_ptr.vmem [resolvable:$true] %s61_s12  ;;  %s47_s16 = int_to_ptr.hbm [resolvable:$true] %s46_s16 }
   0x9   :  { %67 = dma.hbm_to_vmem [thread:$0]  %s60_s8, 512, %s62_s12, [#allocation9], %s485_s9, %s485_s9, %s486_s10  }
   0xa   :  { %s488_s17 = smov [#allocation2]   ;;  %s489_s19 = smov [#allocation7]  }
   0xb   :  { %s22_s18 = sshll.u32 %s488_s17, 4  ;;  %s48_s0 = sshll.u32 %s489_s19, 4  ;;  %s23_s18 = int_to_ptr.vmem [resolvable:$true] %s22_s18  ;;  %s49_s0 = int_to_ptr.vmem [resolvable:$true] %s48_s0 }
   0xc   :  { %28 = dma.hbm_to_vmem [thread:$0]  %s21_s1, 512, %s23_s18, [#allocation3], %s485_s9, %s485_s9, %s486_s10  }
   0xd   :  { %s74_s22 = sshll.u32 %s595_s5, 4  ;;  %s490_s2 = smov [#allocation10]   ;;  %s75_s22 = int_to_ptr.hbm [resolvable:$true] %s74_s22 }
   0xe   :  { %54 = dma.hbm_to_vmem [thread:$0]  %s47_s16, 512, %s49_s0, [#allocation6], %s485_s9, %s485_s9, %s486_s10  }
   0xf   :  { %s76_s23 = sshll.u32 %s490_s2, 4  ;;  %s77_s23 = int_to_ptr.vmem [resolvable:$true] %s76_s23 }
  0x10   :  { %82 = dma.hbm_to_vmem [thread:$0]  %s75_s22, 512, %s77_s23, [#allocation9], %s485_s9, %s485_s9, %s486_s10  }
  0x11   :  { %476 = dma.done.wait [#allocation3], 512  }
  0x12   :  { %477 = vsyncadd [#allocation3], 4294966784 }
  0x13   :  { %478 = dma.done.wait [#allocation6], 1024  }
  0x14   :  { %479 = vsyncadd [#allocation6], 4294966272 }
  0x15   :  { %480 = dma.done.wait [#allocation9], 1024  }
  0x16   :  { %481 = vsyncadd [#allocation9], 4294966272  ;;  %v120_v0 = vld [vmem:[#allocation8 + $0x18] sm:$0xff]  ;;  %v119_v1 = vld [vmem:[#allocation8 + $0x10] sm:$0xff]  ;;  %vm121_vm0 = vcmask 261120   ;;  %s491_s26 = smov [#allocation11]  }
  0x17   :  { %310 = vmatpush.msra.mxu3 %v120_v0  ;;  %v112_v2 = vld [vmem:[#allocation7 + $0x18] sm:$0xff]  ;;  %146 = vmatpush.msra.mxu0 %v120_v0  ;;  %v118_v3 = vld [vmem:[#allocation8 + $0x8] sm:$0xff]  ;;  %v111_v4 = vld [vmem:[#allocation7 + $0x10] sm:$0xff]  ;;  %s281_s27 = sshll.u32 %s491_s26, 4  ;;  %s283_s30 = sshll.u32 %s597_s7, 4  ;;  %s282_s27 = int_to_ptr.vmem [resolvable:$true] %s281_s27  ;;  %s284_s30 = int_to_ptr.hbm [resolvable:$true] %s283_s30 }
  0x18   :  { %314 = vmatpush.msra.mxu1 %v112_v2  ;;  %v110_v5 = vld [vmem:[#allocation7 + $0x8] sm:$0xff]  ;;  %v117_v6 = vld [vmem:[#allocation8] sm:$0xff]  ;;  %v115_v11 = vld [vmem:[#allocation5 + $0x10] sm:$0xff] }
  0x19   :  { %311 = vmatpush.msra.mxu3 %v119_v1  ;;  %147 = vmatpush.msra.mxu0 %v119_v1  ;;  %v114_v7 = vld [vmem:[#allocation5 + $0x8] sm:$0xff]  ;;  %v109_v8 = vld [vmem:[#allocation7] sm:$0xff]  ;;  %v107_v12 = vld [vmem:[#allocation2 + $0x10] sm:$0xff] }
  0x1a   :  { %315 = vmatpush.msra.mxu1 %v111_v4  ;;  %v106_v9 = vld [vmem:[#allocation2 + $0x8] sm:$0xff]  ;;  %v113_v10 = vld [vmem:[#allocation5] sm:$0xff]  ;;  %v116_v14 = vld [vmem:[#allocation5 + $0x18] sm:$0xff] }
  0x1b   :  { %312 = vmatpush.msra.mxu3 %v118_v3  ;;  %148 = vmatpush.msra.mxu0 %v118_v3  ;;  %v105_v13 = vld [vmem:[#allocation2] sm:$0xff]  ;;  %v108_v15 = vld [vmem:[#allocation2 + $0x18] sm:$0xff]  ;;  %v226_v17 = vld [vmem:[#allocation10 + $0x10] sm:$0xff] }
  0x1c   :  { %316 = vmatpush.msra.mxu1 %v110_v5  ;;  %v227_v16 = vld [vmem:[#allocation10 + $0x18] sm:$0xff]  ;;  %v225_v18 = vld [vmem:[#allocation10 + $0x8] sm:$0xff]  ;;  %v224_v19 = vld [vmem:[#allocation10] sm:$0xff] }
  0x1d   :  { %313 = vmatpush.msra.mxu3 %v117_v6  ;;  %149 = vmatpush.msra.mxu0 %v117_v6  ;;  %v330_v22 = vld [vmem:[%s594_s4] ss:$0 sm:$0xff] }
  0x1e   :  { %299 = vmatmul.msk.f32.vlgmr.msra.gmra.mxu3 %vm121_vm0, %v114_v7  ;;  %317 = vmatpush.msra.mxu1 %v109_v8  ;;  %v331_v45 = vld [vmem:[%s596_s6] ss:$0 sm:$0xff] }
  0x1f   :  { %303 = vmatmul.msk.f32.vlgmr.msra.gmra.mxu1 %vm121_vm0, %v106_v9  ;;  %298 = vmatmul.msk.f32.vlgmr.msra.gmra.mxu0 %vm121_vm0, %v113_v10 }
  0x20   :  { %187 = vmatpush.msrb.mxu0 %v112_v2  ;;  %318 = vmatpush.msra.mxu2 %v227_v16 }
  0x22   :  { %188 = vmatpush.msrb.mxu0 %v111_v4  ;;  %319 = vmatpush.msra.mxu2 %v226_v17 }
  0x24   :  { %189 = vmatpush.msrb.mxu0 %v110_v5  ;;  %320 = vmatpush.msra.mxu2 %v225_v18 }
  0x26   :  { %300 = vmatmul.msk.f32.gmra.mxu3 %vm121_vm0, %v115_v11  ;;  %190 = vmatpush.msrb.mxu0 %v109_v8 }
  0x27   :  { %304 = vmatmul.msk.f32.gmra.mxu1 %vm121_vm0, %v107_v12  ;;  %302 = vmatmul.msk.f32.vlgmr.msrb.gmra.mxu0 %vm121_vm0, %v105_v13 }
  0x28   :  { %256 = vmatpush.msra.mxu0 %v227_v16  ;;  %321 = vmatpush.msra.mxu2 %v224_v19 }
  0x2a   :  { %257 = vmatpush.msra.mxu0 %v226_v17 }
  0x2c   :  { %258 = vmatpush.msra.mxu0 %v225_v18 }
  0x2e   :  { %301 = vmatmul.msk.f32.gmra.mxu3 %vm121_vm0, %v116_v14  ;;  %259 = vmatpush.msra.mxu0 %v224_v19 }
  0x2f   :  { %305 = vmatmul.msk.f32.gmra.mxu1 %vm121_vm0, %v108_v15 }
  0x9c   :  { %v195_v20 = vpop.f32.mrf.mxu1  ;;  %v151_v21 = vpop.f32.mrf.mxu0 }
  0xa1   :  { %v154_v23 = vpop.f32.mrf.mxu3 }
  0xa2   :  { %v196_v24 = vadd.f32 %v195_v20, %v154_v23 }
  0xa4   :  { %v209_v25 = vadd.f32 %v330_v22, %v196_v24  ;;  %v192_v26 = vpop.f32.mrf.mxu0  ;;  %v198_v27 = vpop.f32.mrf.mxu1 }
  0xa5   :  { %v193_v28 = vadd.f32 %v192_v26, %v151_v21 }
  0xa6   :  { %vm213_vm1 = vcmp.gt.f32.partialorder %v209_v25, 0.0  ;;  %v217_v29 = vmul.f32 0.2, %v209_v25 }
  0xa7   :  { %v208_v30 = vadd.f32 %v330_v22, %v193_v28 }
  0xa8   :  { %v221_v31 = vsel %vm213_vm1, %v209_v25, %v217_v29 }
  0xa9   :  { %v157_v32 = vpop.f32.mrf.mxu3  ;;  %307 = vmatmul.msk.f32.vlgmr.msra.gmra.mxu2 %vm121_vm0, %v221_v31  ;;  %vm212_vm2 = vcmp.gt.f32.partialorder %v208_v30, 0.0  ;;  %v216_v33 = vmul.f32 0.2, %v208_v30 }
  0xaa   :  { %v199_v34 = vadd.f32 %v198_v27, %v157_v32 }
  0xab   :  { %v220_v35 = vsel %vm212_vm2, %v208_v30, %v216_v33 }
  0xac   :  { %v210_v36 = vadd.f32 %v330_v22, %v199_v34  ;;  %306 = vmatmul.msk.f32.vlgmr.msra.gmra.mxu0 %vm121_vm0, %v220_v35  ;;  %v201_v38 = vpop.f32.mrf.mxu1 }
  0xae   :  { %vm214_vm3 = vcmp.gt.f32.partialorder %v210_v36, 0.0  ;;  %v218_v37 = vmul.f32 0.2, %v210_v36 }
  0xb0   :  { %v222_v39 = vsel %vm214_vm3, %v210_v36, %v218_v37 }
  0xb1   :  { %v160_v40 = vpop.f32.mrf.mxu3  ;;  %308 = vmatmul.msk.f32.gmra.mxu2 %vm121_vm0, %v222_v39 }
  0xb2   :  { %v202_v41 = vadd.f32 %v201_v38, %v160_v40 }
  0xb4   :  { %v211_v42 = vadd.f32 %v330_v22, %v202_v41 }
  0xb6   :  { %vm215_vm4 = vcmp.gt.f32.partialorder %v211_v42, 0.0  ;;  %v219_v43 = vmul.f32 0.2, %v211_v42 }
  0xb8   :  { %v223_v44 = vsel %vm215_vm4, %v211_v42, %v219_v43 }
  0xb9   :  { %309 = vmatmul.msk.f32.gmra.mxu2 %vm121_vm0, %v223_v44 }
 0x129   :  { %v261_v46 = vpop.f32.mrf.mxu0 }
 0x12a   :  { %v262_v47 = vadd.f32 %v331_v45, %v261_v46 }
 0x12c   :  { %v264_v48 = vpop.f32.mrf.mxu2  ;;  %273 = vst.msk [vmem:[#allocation11] sm:$0xff] %vm121_vm0, %v262_v47 }
 0x12d   :  { %v265_v49 = vadd.f32 %v331_v45, %v264_v48 }
 0x12f   :  { %274 = vst.msk [vmem:[#allocation11 + $0x8] sm:$0xff] %vm121_vm0, %v265_v49 }
 0x134   :  { %v267_v50 = vpop.f32.mrf.mxu2 }
 0x135   :  { %v268_v51 = vadd.f32 %v331_v45, %v267_v50 }
 0x137   :  { %275 = vst.msk [vmem:[#allocation11 + $0x10] sm:$0xff] %vm121_vm0, %v268_v51 }
 0x13c   :  { %v270_v52 = vpop.f32.mrf.mxu2 }
 0x13d   :  { %v271_v53 = vadd.f32 %v331_v45, %v270_v52 }
 0x13f   :  { %276 = vst.msk [vmem:[#allocation11 + $0x18] sm:$0xff] %vm121_vm0, %v271_v53 }
 0x140   :  { %289 = dma.vmem_to_hbm [thread:$0]  %s282_s27, 512, %s284_s30, [#allocation4], %s485_s9, %s485_s9, %s486_s10  }
 0x141   :  { %482 = dma.done.wait [#allocation4], 512  }
 0x142   :  { %483 = vsyncadd [#allocation4], 4294966784 }
 0x143   :  { %294 = vsyncpa [#allocation3], 1 }
 0x144   :  { %295 = vsyncpa [#allocation6], 1 }
 0x145   :  { %296 = vsyncpa [#allocation9], 1 }
 0x146   :  { %297 = vsyncpa [#allocation4], 1 }

</bundles_post_ra>
